<compile_context>
chip_gen: v7x
topology: tpu7x:2x2x1
jax: 0.10.0
libtpu: 0.0.40
codegen_flags: <defaults>
</compile_context>

<pallas_src>
import functools

import jax
import jax.numpy as jnp
from jax import lax
from jax.experimental import pallas as pl
from jax.experimental.pallas import tpu as pltpu


# Contract last dim of x (M, K) with last dim of w (N, K) -> (M, N).
# The MXU consumes a transposed RHS natively, so no transpose is needed.
_DOT_DIMS = (((1,), (1,)), ((), ()))


def _dot_nt(x, w, compute_dtype):
    if compute_dtype is not None:
        # In-kernel cast (VPU slot is not the bottleneck here): each operand is
        # read from HBM once at full precision instead of convert+re-read.
        x = x.astype(compute_dtype)
        w = w.astype(compute_dtype)
    return lax.dot_general(x, w, _DOT_DIMS, preferred_element_type=jnp.float32)


def _make_single_step_kernel(compute_dtype):
    """K fits in one block: no accumulator, write the result directly."""

    def kernel(x_ref, w_ref, o_ref):
        o_ref[...] = _dot_nt(x_ref[...], w_ref[...], compute_dtype).astype(
            o_ref.dtype)

    return kernel


def _make_multi_k_kernel_f32_out(compute_dtype):
    """K tiled, f32 output: accumulate straight into the resident output block
    (output index_map (i, j) keeps it in VMEM across the k axis). No scratch."""

    def kernel(x_ref, w_ref, o_ref):
        p = _dot_nt(x_ref[...], w_ref[...], compute_dtype)

        @pl.when(pl.program_id(2) == 0)
        def _():
            o_ref[...] = p

        @pl.when(pl.program_id(2) > 0)
        def _():
            o_ref[...] += p

    return kernel


def _make_multi_k_kernel_cast_out(compute_dtype):
    """K tiled + non-f32 output: f32 accumulator scratch, final accumulate is
    fused with the casting output write."""

    def kernel(x_ref, w_ref, o_ref, acc_ref):
        k = pl.program_id(2)
        nk = pl.num_programs(2)
        p = _dot_nt(x_ref[...], w_ref[...], compute_dtype)

        @pl.when(k == 0)
        def _():
            acc_ref[...] = p

        @pl.when(jnp.logical_and(k > 0, k < nk - 1))
        def _():
            acc_ref[...] += p

        @pl.when(k == nk - 1)
        def _():
            o_ref[...] = (acc_ref[...] + p).astype(o_ref.dtype)

    return kernel


def _working_set_bytes(tm, tn, tk, in_bytes, out_bytes):
    # Pallas double-buffers every BlockSpec operand by default.
    return 2 * (tm * tk * in_bytes + tn * tk * in_bytes + tm * tn * out_bytes)


_RESIDENT_WEIGHT_BUDGET = 24 << 20   # conservative across v5e / v6e / v7x
_VMEM_LIMIT_CAP = 32 << 20           # safe on v7x (64 MiB physical per TC)


@functools.partial(
    jax.jit,
    static_argnames=("tm", "tn", "tk", "compute_dtype", "out_dtype",
                     "resident_weight"),
)
def single_prototype_forward(x, weight, *, tm=512, tn=1024, tk=512,
                             compute_dtype=None, out_dtype=jnp.float32,
                             resident_weight=True):
    """out = x @ weight.T   (nn.Linear with bias=False).

    x:      (batch, output_dim)
    weight: (nmb_prototypes, output_dim)   -- native PyTorch (out, in) layout
    returns (batch, nmb_prototypes) in out_dtype (default float32).
    """
    M, K = x.shape
    N, Kw = weight.shape
    assert K == Kw, "output_dim mismatch"

    in_bytes = max(x.dtype.itemsize, weight.dtype.itemsize)
    out_bytes = jnp.dtype(out_dtype).itemsize
    out_is_f32 = jnp.dtype(out_dtype) == jnp.dtype(jnp.float32)

    # ---- effective block sizes -------------------------------------------
    tm_eff = M if M <= tm else tm
    tk_eff = K if K <= tk else tk
    if N <= tn:
        tn_eff = N
    elif resident_weight and _working_set_bytes(
            tm_eff, N, tk_eff, in_bytes, out_bytes) <= _RESIDENT_WEIGHT_BUDGET:
        # Hold the whole prototype matrix VMEM-resident (n_grid == 1): it is
        # DMA'd once instead of once per output row-block.
        tn_eff = N
    else:
        tn_eff = tn

    m_grid = pl.cdiv(M, tm_eff)
    n_grid = pl.cdiv(N, tn_eff)
    k_grid = pl.cdiv(K, tk_eff)

    # ---- alignment guards for tiled dims ((8/16, 128) tiling rule) --------
    if m_grid > 1:
        sub = max(32 // in_bytes, 32 // out_bytes)
        assert tm_eff % sub == 0, f"tm={tm_eff} must be a multiple of {sub}"
    if n_grid > 1:
        assert tn_eff % 128 == 0, f"tn={tn_eff} must be a multiple of 128"
    if k_grid > 1:
        assert tk_eff % 128 == 0, f"tk={tk_eff} must be a multiple of 128"

    # ---- single-block problem: no grid, no padding, no accumulator --------
    if m_grid == 1 and n_grid == 1 and k_grid == 1:
        return pl.pallas_call(
            _make_single_step_kernel(compute_dtype),
            out_shape=jax.ShapeDtypeStruct((M, N), out_dtype),
            in_specs=[
                pl.BlockSpec(memory_space=pltpu.MemorySpace.VMEM),
                pl.BlockSpec(memory_space=pltpu.MemorySpace.VMEM),
            ],
            out_specs=pl.BlockSpec(memory_space=pltpu.MemorySpace.VMEM),
        )(x, weight)

    # ---- tiled path --------------------------------------------------------
    # Zero-pad ONLY the reduction dim, and only when it is tiled + ragged.
    if k_grid > 1 and K % tk_eff != 0:
        kp = k_grid * tk_eff - K
        x = jnp.pad(x, ((0, 0), (0, kp)))
        weight = jnp.pad(weight, ((0, 0), (0, kp)))
    # M / N ragged boundary blocks need no padding: OOB reads only produce
    # garbage rows/cols that Pallas masks on the output write-back.

    # Grid order: with k un-tiled the inner-loop-constant operand is not
    # re-DMA'd, so put the cheaper re-read pattern on the inner axis.
    traffic_m_outer = M * K + m_grid * N * K   # weight re-streamed per M block
    traffic_n_outer = N * K + n_grid * M * K   # x re-streamed per N block
    swap_mn = (k_grid == 1 and m_grid > 1 and n_grid > 1
               and traffic_n_outer < traffic_m_outer)

    if swap_mn:
        grid = (n_grid, m_grid, k_grid)
        x_map = lambda j, i, k: (i, k)
        w_map = lambda j, i, k: (j, k)
        o_map = lambda j, i, k: (i, j)
    else:
        grid = (m_grid, n_grid, k_grid)
        x_map = lambda i, j, k: (i, k)
        w_map = lambda i, j, k: (j, k)
        o_map = lambda i, j, k: (i, j)

    if k_grid == 1:
        kernel = _make_single_step_kernel(compute_dtype)
        scratch = []
        scratch_bytes = 0
    elif out_is_f32:
        kernel = _make_multi_k_kernel_f32_out(compute_dtype)
        scratch = []
        scratch_bytes = 0
    else:
        kernel = _make_multi_k_kernel_cast_out(compute_dtype)
        scratch = [pltpu.VMEM((tm_eff, tn_eff), jnp.float32)]
        scratch_bytes = tm_eff * tn_eff * 4

    ws = _working_set_bytes(tm_eff, tn_eff, tk_eff, in_bytes, out_bytes)
    ws += scratch_bytes
    vmem_limit = int(min(max(ws * 5 // 4 + (2 << 20), 16 << 20),
                         _VMEM_LIMIT_CAP))

    cost = pl.CostEstimate(
        flops=2 * M * N * K,
        transcendentals=0,
        bytes_accessed=in_bytes * (M * K + N * K) + out_bytes * M * N,
    )

    return pl.pallas_call(
        kernel,
        out_shape=jax.ShapeDtypeStruct((M, N), out_dtype),
        grid_spec=pltpu.PrefetchScalarGridSpec(
            num_scalar_prefetch=0,
            grid=grid,
            in_specs=[
                pl.BlockSpec((tm_eff, tk_eff), x_map),
                pl.BlockSpec((tn_eff, tk_eff), w_map),
            ],
            out_specs=pl.BlockSpec((tm_eff, tn_eff), o_map),
            scratch_shapes=scratch,
        ),
        compiler_params=pltpu.CompilerParams(
            dimension_semantics=("parallel", "parallel", "arbitrary"),
            vmem_limit_bytes=vmem_limit,
        ),
        cost_estimate=cost,
    )(x, weight)


if __name__ == "__main__":
    # SinglePrototype(output_dim=32, nmb_prototypes=24); batch=16.
    batch, output_dim, nmb_prototypes = 16, 32, 24

    key = jax.random.PRNGKey(0)
    k_x, k_w = jax.random.split(key)
    x = jax.random.normal(k_x, (batch, output_dim), dtype=jnp.float32)
    bound = 1.0 / jnp.sqrt(output_dim)
    weight = jax.random.uniform(
        k_w, (nmb_prototypes, output_dim), dtype=jnp.float32,
        minval=-bound, maxval=bound,
    )

    # 1) Tiny shipped shape -> single-block (no grid, no padding) path.
    out = single_prototype_forward(x, weight)
    jax.block_until_ready(out)
    ref = jnp.dot(x, weight.T, precision=jax.lax.Precision.HIGHEST)
    assert out.shape == (batch, nmb_prototypes)
    assert jnp.allclose(out, ref, atol=1e-4, rtol=1e-4)

    # 2) Multi-K tiled path (accumulate into resident f32 output block,
    #    VMEM-resident weight since N fits the budget).
    M2, K2, N2 = 128, 512, 256
    x2 = jax.random.normal(jax.random.PRNGKey(1), (M2, K2), dtype=jnp.float32)
    w2 = 0.05 * jax.random.normal(
        jax.random.PRNGKey(2), (N2, K2), dtype=jnp.float32)
    out2 = single_prototype_forward(x2, w2, tm=64, tn=128, tk=128)
    jax.block_until_ready(out2)
    ref2 = jnp.dot(x2, w2.T, precision=jax.lax.Precision.HIGHEST)
    assert out2.shape == (M2, N2)
    assert jnp.allclose(out2, ref2, atol=1e-2, rtol=1e-2)

    # 2b) Same shapes, bf16 compute + bf16 output (scratch-accumulator path,
    #     in-kernel cast).  Loose tolerance for bf16.
    out2b = single_prototype_forward(
        x2, w2, tm=64, tn=128, tk=128,
        compute_dtype=jnp.bfloat16, out_dtype=jnp.bfloat16)
    jax.block_until_ready(out2b)
    assert out2b.dtype == jnp.bfloat16
    assert jnp.allclose(out2b.astype(jnp.float32), ref2, atol=0.1, rtol=0.1)

    # 3) Ragged M, no pad / no output slice, VMEM-resident weight, k un-tiled.
    M3, K3, N3 = 300, 96, 272
    x3 = jax.random.normal(jax.random.PRNGKey(3), (M3, K3), dtype=jnp.float32)
    w3 = 0.1 * jax.random.normal(
        jax.random.PRNGKey(4), (N3, K3), dtype=jnp.float32)
    out3 = single_prototype_forward(x3, w3, tm=128, tn=512, tk=512)
    jax.block_until_ready(out3)
    ref3 = jnp.dot(x3, w3.T, precision=jax.lax.Precision.HIGHEST)
    assert out3.shape == (M3, N3)
    assert jnp.allclose(out3, ref3, atol=1e-3, rtol=1e-3)

    # 4) Force the N-tiled fallback (resident_weight=False) with ragged M and
    #    ragged N; also exercises the grid-order (n-outer) selection.
    M4, K4, N4 = 390, 128, 250
    x4 = jax.random.normal(jax.random.PRNGKey(5), (M4, K4), dtype=jnp.float32)
    w4 = 0.1 * jax.random.normal(
        jax.random.PRNGKey(6), (N4, K4), dtype=jnp.float32)
    out4 = single_prototype_forward(
        x4, w4, tm=128, tn=128, tk=128, resident_weight=False)
    jax.block_until_ready(out4)
    ref4 = jnp.dot(x4, w4.T, precision=jax.lax.Precision.HIGHEST)
    assert out4.shape == (M4, N4)
    assert jnp.allclose(out4, ref4, atol=1e-3, rtol=1e-3)

    print("KERNEL_OK")
</pallas_src>

<mosaic_0001>
module attributes {stable_mosaic.version = 11 : i64} {
  func.func @kernel(%arg0: memref<16x32xf32, #tpu.memory_space<vmem>>, %arg1: memref<24x32xf32, #tpu.memory_space<vmem>>, %arg2: memref<16x24xf32, #tpu.memory_space<vmem>>) attributes {dimension_semantics = [], scalar_prefetch = 0 : i64, scratch_operands = 0 : i64, tpu.core_type = #tpu.core_type<tc>} {
    %c0 = arith.constant 0 : index
    %c0_0 = arith.constant 0 : index
    %0 = vector.load %arg0[%c0, %c0_0] : memref<16x32xf32, #tpu.memory_space<vmem>>, vector<16x32xf32>
    %c0_1 = arith.constant 0 : index
    %c0_2 = arith.constant 0 : index
    %1 = vector.load %arg1[%c0_1, %c0_2] : memref<24x32xf32, #tpu.memory_space<vmem>>, vector<24x32xf32>
    %cst = arith.constant dense<0.000000e+00> : vector<16x24xf32>
    %2 = tpu.matmul %0, %1, %cst {dimension_numbers = #tpu.dot_dimension_numbers<[1], [1], [0], [0], [0, 0, 1, 0], [], []>} : vector<16x32xf32>, vector<24x32xf32>, vector<16x24xf32> -> vector<16x24xf32>
    %c0_3 = arith.constant 0 : index
    %c0_4 = arith.constant 0 : index
    %3 = vector.load %arg2[%c0_3, %c0_4] : memref<16x24xf32, #tpu.memory_space<vmem>>, vector<16x24xf32>
    tpu.vector_store %arg2[%c0_3, %c0_4], %2 {strides = array<i32>} : memref<16x24xf32, #tpu.memory_space<vmem>>, vector<16x24xf32>,
    return
  }
}

</mosaic_0001>

<bundles_post_ra>
// kernel: single_prototype_forward.1
= control target key start
LH: loop header
LB: loop body
LE: loop exit
PB: predicated region body
PF: predicated region fallthrough
CT: control target
= control target key end

     0   :  { %7 = vsyncpa [#allocation3], 0  ;;  %s324_s0 = inlined_call_operand.hbm [shape: f32[16,32], index: 0, kind: input, shape index: {}]   ;;  %s325_s1 = inlined_call_operand.hbm [shape: f32[24,32], index: 1, kind: input, shape index: {}]   ;;  %s326_s2 = inlined_call_operand.hbm [shape: f32[16,24], index: 2, kind: output, shape index: {}]  }
   0x1   :  { %8 = vsyncpa [#allocation6], 0 }
   0x2   :  { %9 = vsyncpa [#allocation4], 0  ;;  %s259_s9 = smov [#allocation2]   ;;  %s187_s13 = scalar_lea.hbm %s324_s0, 256 }
   0x3   :  { %s15_s10 = sshll.u32 %s259_s9, 4  ;;  %p188_p0 = scmp.ne.s32.totalorder %s324_s0, %s187_s13  ;;  %s16_s10 = int_to_ptr.vmem [resolvable:$true] %s15_s10 }
   0x4   :  { %p191_p1 = scmp.lt.u32.totalorder %s187_s13, %s324_s0 }
   0x6   :  { %p193_p2 = pnand %p191_p1, %p188_p0 }
   0x8   :  { %196 = shalt.err (!%p193_p2)
}
   0x9   :  { %s197_s18 = scalar_lea.vmem %s16_s10, 256  ;;  %p202_p4 = scmp.lt.s32.totalorder %s16_s10, %s16_s10 }
   0xa   :  { %p198_p3 = scmp.ne.s32.totalorder %s16_s10, %s197_s18  ;;  %p203_p5 = scmp.lt.s32.totalorder %s197_s18, %s197_s18 }
   0xc   :  { %p204_p6 = por %p203_p5, %p202_p4 }
   0xe   :  { %p205_p7 = pnand %p204_p6, %p198_p3 }
  0x10   :  { %208 = shalt.err (!%p205_p7)
}
  0x11   :  { %s260_s19 = smov 128   ;;  %s261_s20 = smov 8  }
  0x12   :  { %21 = dma.hbm_to_vmem [thread:$0]  %s324_s0, 256, %s16_s10, [#allocation3], %s260_s19, %s260_s19, %s261_s20  }
  0x13   :  { %s262_s23 = smov [#allocation5]   ;;  %s209_s27 = scalar_lea.hbm %s325_s1, 384 }
  0x14   :  { %s27_s24 = sshll.u32 %s262_s23, 4  ;;  %p210_p8 = scmp.ne.s32.totalorder %s325_s1, %s209_s27  ;;  %s28_s24 = int_to_ptr.vmem [resolvable:$true] %s27_s24 }
  0x15   :  { %p213_p9 = scmp.lt.u32.totalorder %s209_s27, %s325_s1 }
  0x17   :  { %p215_p10 = pnand %p213_p9, %p210_p8 }
  0x19   :  { %218 = shalt.err (!%p215_p10)
}
  0x1a   :  { %s219_s4 = scalar_lea.vmem %s28_s24, 384  ;;  %p224_p12 = scmp.lt.s32.totalorder %s28_s24, %s28_s24 }
  0x1b   :  { %p220_p11 = scmp.ne.s32.totalorder %s28_s24, %s219_s4  ;;  %p225_p13 = scmp.lt.s32.totalorder %s219_s4, %s219_s4 }
  0x1d   :  { %p226_p0 = por %p225_p13, %p224_p12 }
  0x1f   :  { %p227_p1 = pnand %p226_p0, %p220_p11 }
  0x21   :  { %230 = shalt.err (!%p227_p1)
}
  0x22   :  { %33 = dma.hbm_to_vmem [thread:$0]  %s325_s1, 384, %s28_s24, [#allocation6], %s260_s19, %s260_s19, %s261_s20  }
  0x23   :  { %253 = dma.done.wait [#allocation3], 256  }
  0x24   :  { %254 = vsyncadd [#allocation3], 4294967040 }
  0x25   :  { %255 = dma.done.wait [#allocation6], 384  }
  0x26   :  { %256 = vsyncadd [#allocation6], 4294966912  ;;  %vm45_vm0 = vcmask 261120   ;;  %v42_v0 = vld [vmem:[#allocation5] sm:$0xff]  ;;  %v43_v1 = vld [vmem:[#allocation5 + $0x8] sm:$0xff]  ;;  %s263_s6 = smov [#allocation7]  }
  0x27   :  { %vm177_vm1 = vmpackc.low %vm45_vm0, %vm45_vm0  ;;  %v176_v2 = vpack.c.bf16 %v43_v1, %v42_v0  ;;  %v40_v3 = vld [vmem:[#allocation2] sm:$0xff]  ;;  %v41_v5 = vld [vmem:[#allocation2 + $0x8] sm:$0xff]  ;;  %s144_s1 = sshll.u32 %s263_s6, 4  ;;  %vm136_vm2 = vcmask 195584   ;;  %s145_s1 = int_to_ptr.vmem [resolvable:$true] %s144_s1 }
  0x28   :  { %v44_v4 = vld [vmem:[#allocation5 + $0x10] sm:$0xff]  ;;  %173 = vmatprep.mubr.msk.f32.mxu0 %vm45_vm0, %v40_v3  ;;  %s231_s7 = scalar_lea.vmem %s145_s1, 256  ;;  %p236_p3 = scmp.lt.s32.totalorder %s145_s1, %s145_s1 }
  0x29   :  { %178 = vmatprep.subr.msk.bf16.mxu0 %vm177_vm1, %v176_v2  ;;  %p232_p2 = scmp.ne.s32.totalorder %s145_s1, %s231_s7  ;;  %p237_p4 = scmp.lt.s32.totalorder %s231_s7, %s231_s7 }
  0x2a   :  { %181 = vmatpush3.bf16.xpose.msk.msra.mxu0 %vm177_vm1, %v176_v2 }
  0x2b   :  { %171 = vmatprep.subr.msk.mxu0 %vm45_vm0, %v44_v4  ;;  %p238_p5 = por %p237_p4, %p236_p3 }
  0x2d   :  { %p239_p6 = pnand %p238_p5, %p232_p2 }
  0x32   :  { %172 = vmatpush3.xpose.msk.msra.mxu0 %vm45_vm0, %v44_v4 }
  0x35   :  { %174 = vmatmul.mubr.msk.f32.vlgmr.msra.gmra.mrb[0].mxu0 %vm45_vm0, %v41_v5 }
 0x108   :  { %v175_v6 = vpop.f32.mrb[0].mxu0 }
 0x109   :  { %138 = vst.msk [vmem:[#allocation7 + $0x8] sm:$0xff] %vm136_vm2, %v175_v6  ;;  %v127_v7 = vpop.f32.mrb[1].mxu0 }
 0x10a   :  { %137 = vst.msk [vmem:[#allocation7] sm:$0xff] %vm136_vm2, %v127_v7 }
 0x10b   :  { %242 = shalt.err (!%p239_p6)
}
 0x10c   :  { %s243_s10 = scalar_lea.hbm %s326_s2, 256 }
 0x10d   :  { %p244_p7 = scmp.ne.s32.totalorder %s326_s2, %s243_s10  ;;  %p247_p8 = scmp.lt.u32.totalorder %s243_s10, %s326_s2 }
 0x10f   :  { %p249_p9 = pnand %p247_p8, %p244_p7 }
 0x111   :  { %252 = shalt.err (!%p249_p9)
}
 0x112   :  { %150 = dma.vmem_to_hbm [thread:$0]  %s145_s1, 256, %s326_s2, [#allocation4], %s260_s19, %s260_s19, %s261_s20  }
 0x113   :  { %257 = dma.done.wait [#allocation4], 256  }
 0x114   :  { %258 = vsyncadd [#allocation4], 4294967040 }
 0x115   :  { %154 = vsyncpa [#allocation3], 1 }
 0x116   :  { %155 = vsyncpa [#allocation6], 1 }
 0x117   :  { %156 = vsyncpa [#allocation4], 1 }

</bundles_post_ra>
